<compile_context>
chip_gen: v7x
topology: tpu7x:2x2x1
jax: 0.10.0
libtpu: 0.0.40
codegen_flags: <defaults>
</compile_context>

<pallas_src>
import functools

import jax
import jax.numpy as jnp
from jax.experimental import pallas as pl
from jax.experimental.pallas import tpu as pltpu

LANE = 128
SUBLANE = 8
LOG_STD_MIN = -20.0
LOG_STD_MAX = 2.0


def _round_up(x, m):
    return (x + m - 1) // m * m


def _num_tensorcores():
    """Best-effort TensorCore count per chip (v7x has 2; v5e/v6e have 1)."""
    try:
        kind = jax.devices()[0].device_kind.lower()
    except Exception:
        return 1
    return 2 if "v7" in kind else 1


# --------------------------------------------------------------------------- #
# Kernel
# --------------------------------------------------------------------------- #
def actor_kernel(state_ref, w1_ref, b1_ref, w2_ref, b2_ref, wh_ref, bh_ref,
                 out_ref, *, action_dim):
    """One batch-tile of the Actor forward pass.

    state_ref : (TM, S)          f32
    w1_ref    : (S, Hp)          f32 or bf16   (Hp = hidden padded to 128)
    w2_ref    : (Hp, Hp)
    wh_ref    : (Hp, 2A)         fused [mean | log_std] head
    b*_ref    : (1, Hp)/(1, 2A)  f32 (elementwise kept in f32 for v5e VPU)
    out_ref   : (TM, 2A)         f32 [mean | clamped log_std]
    """
    wdt = w1_ref.dtype
    x = state_ref[...]

    # Hidden layer 1: Linear + ReLU  (MXU in weight dtype, f32 accumulate)
    h = jnp.dot(x.astype(wdt), w1_ref[...], preferred_element_type=jnp.float32)
    h = jnp.maximum(h + b1_ref[...], 0.0)

    # Hidden layer 2: Linear + ReLU
    h = jnp.dot(h.astype(wdt), w2_ref[...], preferred_element_type=jnp.float32)
    h = jnp.maximum(h + b2_ref[...], 0.0)

    # Fused mean / log_std head: one matmul, one store.
    head = jnp.dot(h.astype(wdt), wh_ref[...], preferred_element_type=jnp.float32)
    head = head + bh_ref[...]

    # clamp(-20, 2) only on the log_std lanes [action_dim, 2*action_dim).
    # The output has no padded lanes, so a single compare suffices.
    col = jax.lax.broadcasted_iota(jnp.int32, head.shape, 1)
    head = jnp.where(col >= action_dim,
                     jnp.clip(head, LOG_STD_MIN, LOG_STD_MAX),
                     head)

    out_ref[...] = head.astype(out_ref.dtype)


# --------------------------------------------------------------------------- #
# Parameter preparation (one-time: fuse heads + zero-pad hidden lanes to 128)
# --------------------------------------------------------------------------- #
def prepare_params(params, weights_dtype=jnp.float32):
    """Fuse head weights and zero-pad the hidden dim to a multiple of 128.

    Zero padding keeps the math identical: padded hidden units are
    ReLU(0 + 0) = 0 and feed zero weight rows into the next layer.
    The fused head output stays at its natural 2*action_dim width.
    """
    w1, b1, w2, b2, wm, bm, ws, bs = params
    s_dim, h_dim = w1.shape
    a_dim = wm.shape[1]

    hp = _round_up(h_dim, LANE)
    out_dim = 2 * a_dim

    w_head = jnp.concatenate([wm, ws], axis=1)          # (H, 2A)
    b_head = jnp.concatenate([bm, bs], axis=1)          # (1, 2A)

    w1p = jnp.zeros((s_dim, hp), weights_dtype).at[:, :h_dim].set(
        w1.astype(weights_dtype))
    b1p = jnp.zeros((1, hp), jnp.float32).at[:, :h_dim].set(b1)
    w2p = jnp.zeros((hp, hp), weights_dtype).at[:h_dim, :h_dim].set(
        w2.astype(weights_dtype))
    b2p = jnp.zeros((1, hp), jnp.float32).at[:, :h_dim].set(b2)
    whp = jnp.zeros((hp, out_dim), weights_dtype).at[:h_dim, :].set(
        w_head.astype(weights_dtype))
    bhp = b_head.astype(jnp.float32)

    return {
        "w1": w1p, "b1": b1p, "w2": w2p, "b2": b2p, "wh": whp, "bh": bhp,
        "state_dim": s_dim, "hidden_pad": hp, "out_dim": out_dim,
        "action_dim": a_dim,
    }


# --------------------------------------------------------------------------- #
# Wrapper
# --------------------------------------------------------------------------- #
def actor_forward(state, prepared, tm=512):
    """Actor forward. Returns (mean, log_std) with shapes (B, action_dim)."""
    b, s_dim = state.shape
    assert s_dim == prepared["state_dim"]
    a_dim = prepared["action_dim"]
    hp = prepared["hidden_pad"]
    out_dim = prepared["out_dim"]

    # Pad batch to a multiple of the f32 sublane (8); the grid uses cdiv so
    # the batch tile need not divide the padded batch exactly.
    bp = _round_up(b, SUBLANE)
    if bp != b:
        state = jnp.pad(state, ((0, bp - b), (0, 0)))

    # Batch tile: big (overhead-bound kernel), multiple of 8, capped so that
    # multi-TensorCore chips (v7x) get >= 2 grid steps on the parallel axis.
    tm = _round_up(min(tm, bp), SUBLANE)
    ntc = _num_tensorcores()
    if ntc > 1 and bp >= 2 * SUBLANE:
        tm = min(tm, _round_up(pl.cdiv(bp, ntc), SUBLANE))

    grid = (pl.cdiv(bp, tm),)

    w1, b1, w2, b2, wh, bh = (prepared["w1"], prepared["b1"], prepared["w2"],
                              prepared["b2"], prepared["wh"], prepared["bh"])

    flops = 2 * bp * (s_dim * hp + hp * hp + hp * out_dim)
    weight_bytes = sum(int(a.size) * a.dtype.itemsize
                       for a in (w1, b1, w2, b2, wh, bh))
    bytes_accessed = (state.size * state.dtype.itemsize
                      + weight_bytes
                      + bp * out_dim * 4)

    # VMEM planning: resident weights are double-buffered by default; raise
    # the scoped limit only when large hidden dims need it (cap for v7x 64MiB).
    io_tile_bytes = tm * (s_dim + out_dim) * 4
    vmem_need = 2 * (weight_bytes + io_tile_bytes) + 3 * tm * hp * 4
    cp_kwargs = dict(dimension_semantics=("parallel",))
    if vmem_need > (32 << 20):
        cp_kwargs["vmem_limit_bytes"] = int(min(vmem_need + (4 << 20), 64 << 20))

    out = pl.pallas_call(
        functools.partial(actor_kernel, action_dim=a_dim),
        out_shape=jax.ShapeDtypeStruct((bp, out_dim), jnp.float32),
        grid=grid,
        in_specs=[
            pl.BlockSpec((tm, s_dim), lambda i: (i, 0)),       # state tile
            pl.BlockSpec((s_dim, hp), lambda i: (0, 0)),       # w1 (resident)
            pl.BlockSpec((1, hp), lambda i: (0, 0)),           # b1
            pl.BlockSpec((hp, hp), lambda i: (0, 0)),          # w2
            pl.BlockSpec((1, hp), lambda i: (0, 0)),           # b2
            pl.BlockSpec((hp, out_dim), lambda i: (0, 0)),     # fused head W
            pl.BlockSpec((1, out_dim), lambda i: (0, 0)),      # fused head b
        ],
        out_specs=pl.BlockSpec((tm, out_dim), lambda i: (i, 0)),
        compiler_params=pltpu.CompilerParams(**cp_kwargs),
        cost_estimate=pl.CostEstimate(
            flops=flops, transcendentals=0, bytes_accessed=bytes_accessed),
    )(state, w1, b1, w2, b2, wh, bh)

    mean = out[:b, :a_dim]
    log_std = out[:b, a_dim:]
    return mean, log_std


# --------------------------------------------------------------------------- #
# Reference + synthetic params
# --------------------------------------------------------------------------- #
def init_params(key, state_dim, action_dim, hidden_dim):
    """Deterministic synthetic parameters (PyTorch-Linear-like uniform init).
    Weights stored as (in_dim, out_dim): y = x @ W + b (same math as nn.Linear).
    """
    ks = jax.random.split(key, 8)

    def lin(kw, kb, fan_in, fan_out):
        bound = 1.0 / jnp.sqrt(fan_in)
        w = jax.random.uniform(kw, (fan_in, fan_out), jnp.float32, -bound, bound)
        b = jax.random.uniform(kb, (1, fan_out), jnp.float32, -bound, bound)
        return w, b

    w1, b1 = lin(ks[0], ks[1], state_dim, hidden_dim)
    w2, b2 = lin(ks[2], ks[3], hidden_dim, hidden_dim)
    wm, bm = lin(ks[4], ks[5], hidden_dim, action_dim)
    ws, bs = lin(ks[6], ks[7], hidden_dim, action_dim)
    return (w1, b1, w2, b2, wm, bm, ws, bs)


def actor_forward_ref(state, params):
    """Pure-JAX reference for validation."""
    w1, b1, w2, b2, wm, bm, ws, bs = params
    h = jnp.maximum(state @ w1 + b1, 0.0)
    h = jnp.maximum(h @ w2 + b2, 0.0)
    mean = h @ wm + bm
    log_std = jnp.clip(h @ ws + bs, LOG_STD_MIN, LOG_STD_MAX)
    return mean, log_std


if __name__ == "__main__":
    # Small shapes consistent with Actor(state_dim=16, action_dim=4, hidden_dim=32)
    batch, state_dim, action_dim, hidden_dim = 8, 16, 4, 32

    key = jax.random.PRNGKey(0)
    k_state, k_params = jax.random.split(key)
    state = jax.random.normal(k_state, (batch, state_dim), jnp.float32)
    params = init_params(k_params, state_dim, action_dim, hidden_dim)
    mean_ref, log_std_ref = actor_forward_ref(state, params)

    # --- f32 weights (exact path) ---------------------------------------- #
    prepared_f32 = prepare_params(params, weights_dtype=jnp.float32)
    mean, log_std = actor_forward(state, prepared_f32)
    jax.block_until_ready((mean, log_std))

    assert mean.shape == (batch, action_dim)
    assert log_std.shape == (batch, action_dim)
    assert jnp.allclose(mean, mean_ref, atol=1e-5, rtol=1e-5)
    assert jnp.allclose(log_std, log_std_ref, atol=1e-5, rtol=1e-5)
    assert jnp.all(log_std >= LOG_STD_MIN) and jnp.all(log_std <= LOG_STD_MAX)

    # --- bf16 weights (bf16 MXU fast path; f32 accumulate/elementwise) ---- #
    prepared_bf16 = prepare_params(params, weights_dtype=jnp.bfloat16)
    mean_b, log_std_b = actor_forward(state, prepared_bf16)
    jax.block_until_ready((mean_b, log_std_b))
    assert jnp.allclose(mean_b, mean_ref, atol=2e-2, rtol=2e-2)
    assert jnp.allclose(log_std_b, log_std_ref, atol=2e-2, rtol=2e-2)

    # --- non-multiple-of-8 batch (cdiv grid / masked edge block) ---------- #
    state2 = jax.random.normal(jax.random.PRNGKey(1), (5, state_dim), jnp.float32)
    m2, ls2 = actor_forward(state2, prepared_f32)
    jax.block_until_ready((m2, ls2))
    m2_ref, ls2_ref = actor_forward_ref(state2, params)
    assert jnp.allclose(m2, m2_ref, atol=1e-5, rtol=1e-5)
    assert jnp.allclose(ls2, ls2_ref, atol=1e-5, rtol=1e-5)

    # NOTE: .sample() (rsample + tanh squashing + log_prob) is stochastic and lives
    # outside forward(); only forward() is implemented in the kernel.
    # TODO(synk): optionally fuse std = exp(log_std) into the kernel epilogue for
    # inference callers that immediately need std (forward() semantics kept as-is).
    print("KERNEL_OK")
</pallas_src>

<mosaic_0001>
module attributes {stable_mosaic.version = 11 : i64} {
  func.func @actor_kernel(%arg0: i32, %arg1: memref<8x16xf32, #tpu.memory_space<vmem>>, %arg2: memref<16x128xf32, #tpu.memory_space<vmem>>, %arg3: memref<1x128xf32, #tpu.memory_space<vmem>>, %arg4: memref<128x128xf32, #tpu.memory_space<vmem>>, %arg5: memref<1x128xf32, #tpu.memory_space<vmem>>, %arg6: memref<128x8xf32, #tpu.memory_space<vmem>>, %arg7: memref<1x8xf32, #tpu.memory_space<vmem>>, %arg8: memref<8x8xf32, #tpu.memory_space<vmem>>) attributes {dimension_semantics = [#tpu.dimension_semantics<parallel>], iteration_bounds = array<i64: 1>, scalar_prefetch = 0 : i64, scratch_operands = 0 : i64, tpu.core_type = #tpu.core_type<tc>, window_params = [{transform_indices = @transform_0, window_bounds = array<i64: 8, 16>}, {pipeline_mode = #tpu.pipeline_mode<synchronous>, transform_indices = @transform_1, window_bounds = array<i64: 16, 128>}, {pipeline_mode = #tpu.pipeline_mode<synchronous>, transform_indices = @transform_2, window_bounds = array<i64: 1, 128>}, {pipeline_mode = #tpu.pipeline_mode<synchronous>, transform_indices = @transform_3, window_bounds = array<i64: 128, 128>}, {pipeline_mode = #tpu.pipeline_mode<synchronous>, transform_indices = @transform_4, window_bounds = array<i64: 1, 128>}, {pipeline_mode = #tpu.pipeline_mode<synchronous>, transform_indices = @transform_5, window_bounds = array<i64: 128, 8>}, {pipeline_mode = #tpu.pipeline_mode<synchronous>, transform_indices = @transform_6, window_bounds = array<i64: 1, 8>}, {transform_indices = @transform_7, window_bounds = array<i64: 8, 8>}]} {
    %c0 = arith.constant 0 : index
    %c0_0 = arith.constant 0 : index
    %0 = vector.load %arg1[%c0, %c0_0] : memref<8x16xf32, #tpu.memory_space<vmem>>, vector<8x16xf32>
    %c0_1 = arith.constant 0 : index
    %c0_2 = arith.constant 0 : index
    %1 = vector.load %arg2[%c0_1, %c0_2] : memref<16x128xf32, #tpu.memory_space<vmem>>, vector<16x128xf32>
    %cst = arith.constant dense<0.000000e+00> : vector<8x128xf32>
    %2 = tpu.matmul %0, %1, %cst {dimension_numbers = #tpu.dot_dimension_numbers<[1], [0], [0], [1], [0, 0, 1, 1], [], []>} : vector<8x16xf32>, vector<16x128xf32>, vector<8x128xf32> -> vector<8x128xf32>
    %c0_3 = arith.constant 0 : index
    %c0_4 = arith.constant 0 : index
    %3 = vector.load %arg3[%c0_3, %c0_4] : memref<1x128xf32, #tpu.memory_space<vmem>>, vector<1x128xf32>
    %4 = vector.broadcast %3 : vector<1x128xf32> to vector<8x128xf32>
    %5 = arith.addf %2, %4 : vector<8x128xf32>
    %cst_5 = arith.constant 0.000000e+00 : f32
    %6 = vector.broadcast %cst_5 : f32 to vector<8x128xf32>
    %7 = arith.maximumf %5, %6 : vector<8x128xf32>
    %c0_6 = arith.constant 0 : index
    %c0_7 = arith.constant 0 : index
    %8 = vector.load %arg4[%c0_6, %c0_7] : memref<128x128xf32, #tpu.memory_space<vmem>>, vector<128x128xf32>
    %cst_8 = arith.constant dense<0.000000e+00> : vector<8x128xf32>
    %9 = tpu.matmul %7, %8, %cst_8 {dimension_numbers = #tpu.dot_dimension_numbers<[1], [0], [0], [1], [0, 0, 1, 1], [], []>} : vector<8x128xf32>, vector<128x128xf32>, vector<8x128xf32> -> vector<8x128xf32>
    %c0_9 = arith.constant 0 : index
    %c0_10 = arith.constant 0 : index
    %10 = vector.load %arg5[%c0_9, %c0_10] : memref<1x128xf32, #tpu.memory_space<vmem>>, vector<1x128xf32>
    %11 = vector.broadcast %10 : vector<1x128xf32> to vector<8x128xf32>
    %12 = arith.addf %9, %11 : vector<8x128xf32>
    %cst_11 = arith.constant 0.000000e+00 : f32
    %13 = vector.broadcast %cst_11 : f32 to vector<8x128xf32>
    %14 = arith.maximumf %12, %13 : vector<8x128xf32>
    %c0_12 = arith.constant 0 : index
    %c0_13 = arith.constant 0 : index
    %15 = vector.load %arg6[%c0_12, %c0_13] : memref<128x8xf32, #tpu.memory_space<vmem>>, vector<128x8xf32>
    %cst_14 = arith.constant dense<0.000000e+00> : vector<8x8xf32>
    %16 = tpu.matmul %14, %15, %cst_14 {dimension_numbers = #tpu.dot_dimension_numbers<[1], [0], [0], [1], [0, 0, 1, 1], [], []>} : vector<8x128xf32>, vector<128x8xf32>, vector<8x8xf32> -> vector<8x8xf32>
    %c0_15 = arith.constant 0 : index
    %c0_16 = arith.constant 0 : index
    %17 = vector.load %arg7[%c0_15, %c0_16] : memref<1x8xf32, #tpu.memory_space<vmem>>, vector<1x8xf32>
    %18 = vector.broadcast %17 : vector<1x8xf32> to vector<8x8xf32>
    %19 = arith.addf %16, %18 : vector<8x8xf32>
    %20 = tpu.iota {dimensions = array<i32: 1>} : vector<8x8xi32>
    %c4_i32 = arith.constant 4 : i32
    %21 = vector.broadcast %c4_i32 : i32 to vector<8x8xi32>
    %22 = arith.cmpi sge, %20, %21 : vector<8x8xi32>
    %cst_17 = arith.constant -2.000000e+01 : f32
    %cst_18 = arith.constant 2.000000e+00 : f32
    %23 = vector.broadcast %cst_17 : f32 to vector<8x8xf32>
    %24 = arith.maximumf %23, %19 : vector<8x8xf32>
    %25 = vector.broadcast %cst_18 : f32 to vector<8x8xf32>
    %26 = arith.minimumf %25, %24 : vector<8x8xf32>
    %27 = arith.select %22, %26, %19 : vector<8x8xi1>, vector<8x8xf32>
    %c0_19 = arith.constant 0 : index
    %c0_20 = arith.constant 0 : index
    %28 = vector.load %arg8[%c0_19, %c0_20] : memref<8x8xf32, #tpu.memory_space<vmem>>, vector<8x8xf32>
    tpu.vector_store %arg8[%c0_19, %c0_20], %27 {strides = array<i32>} : memref<8x8xf32, #tpu.memory_space<vmem>>, vector<8x8xf32>,
    return
  }
  func.func @transform_0(%arg0: i32) -> (i32, i32) {
    %c0_i32 = arith.constant 0 : i32
    %c0_i32_0 = arith.constant 0 : i32
    return %arg0, %c0_i32 : i32, i32
  }
  func.func @transform_1(%arg0: i32) -> (i32, i32) {
    %c0_i32 = arith.constant 0 : i32
    %c0_i32_0 = arith.constant 0 : i32
    %c0_i32_1 = arith.constant 0 : i32
    return %c0_i32, %c0_i32_0 : i32, i32
  }
  func.func @transform_2(%arg0: i32) -> (i32, i32) {
    %c0_i32 = arith.constant 0 : i32
    %c0_i32_0 = arith.constant 0 : i32
    %c0_i32_1 = arith.constant 0 : i32
    return %c0_i32, %c0_i32_0 : i32, i32
  }
  func.func @transform_3(%arg0: i32) -> (i32, i32) {
    %c0_i32 = arith.constant 0 : i32
    %c0_i32_0 = arith.constant 0 : i32
    %c0_i32_1 = arith.constant 0 : i32
    return %c0_i32, %c0_i32_0 : i32, i32
  }
  func.func @transform_4(%arg0: i32) -> (i32, i32) {
    %c0_i32 = arith.constant 0 : i32
    %c0_i32_0 = arith.constant 0 : i32
    %c0_i32_1 = arith.constant 0 : i32
    return %c0_i32, %c0_i32_0 : i32, i32
  }
  func.func @transform_5(%arg0: i32) -> (i32, i32) {
    %c0_i32 = arith.constant 0 : i32
    %c0_i32_0 = arith.constant 0 : i32
    %c0_i32_1 = arith.constant 0 : i32
    return %c0_i32, %c0_i32_0 : i32, i32
  }
  func.func @transform_6(%arg0: i32) -> (i32, i32) {
    %c0_i32 = arith.constant 0 : i32
    %c0_i32_0 = arith.constant 0 : i32
    %c0_i32_1 = arith.constant 0 : i32
    return %c0_i32, %c0_i32_0 : i32, i32
  }
  func.func @transform_7(%arg0: i32) -> (i32, i32) {
    %c0_i32 = arith.constant 0 : i32
    %c0_i32_0 = arith.constant 0 : i32
    return %arg0, %c0_i32 : i32, i32
  }
}

</mosaic_0001>

<bundles_post_ra>
// kernel: tpu_custom_call.1
= control target key start
LH: loop header
LB: loop body
LE: loop exit
PB: predicated region body
PF: predicated region fallthrough
CT: control target
= control target key end

     0   :  { %12 = vsyncpa [#allocation3], 0  ;;  %s756_s0 = inlined_call_operand.hbm [shape: f32[8,16], index: 0, kind: input, shape index: {}]   ;;  %s757_s1 = inlined_call_operand.vmem [shape: f32[16,128], index: 1, kind: input, shape index: {}]   ;;  %s758_s2 = inlined_call_operand.vmem [shape: f32[1,128], index: 2, kind: input, shape index: {}]   ;;  %s759_s3 = inlined_call_operand.vmem [shape: f32[128,128], index: 3, kind: input, shape index: {}]   ;;  %s760_s4 = inlined_call_operand.vmem [shape: f32[1,128], index: 4, kind: input, shape index: {}]   ;;  %s761_s5 = inlined_call_operand.vmem [shape: f32[128,8], index: 5, kind: input, shape index: {}]   ;;  %s762_s6 = inlined_call_operand.vmem [shape: f32[1,8], index: 6, kind: input, shape index: {}]   ;;  %s763_s7 = inlined_call_operand.hbm [shape: f32[8,8], index: 7, kind: output, shape index: {}]  }
   0x1   :  { %13 = vsyncpa [#allocation4], 0  ;;  %s556_s24 = smov [#allocation2]   ;;  %s508_s28 = scalar_lea.hbm %s756_s0, 128 }
   0x2   :  { %s20_s25 = sshll.u32 %s556_s24, 4  ;;  %p509_p0 = scmp.ne.s32.totalorder %s756_s0, %s508_s28  ;;  %s21_s25 = int_to_ptr.vmem [resolvable:$true] %s20_s25 }
   0x3   :  { %p512_p1 = scmp.lt.u32.totalorder %s508_s28, %s756_s0 }
   0x5   :  { %p514_p2 = pnand %p512_p1, %p509_p0 }
   0x7   :  { %517 = shalt.err (!%p514_p2)
}
   0x8   :  { %s518_s10 = scalar_lea.vmem %s21_s25, 128  ;;  %p523_p4 = scmp.lt.s32.totalorder %s21_s25, %s21_s25 }
   0x9   :  { %p519_p3 = scmp.ne.s32.totalorder %s21_s25, %s518_s10  ;;  %p524_p5 = scmp.lt.s32.totalorder %s518_s10, %s518_s10 }
   0xb   :  { %p525_p6 = por %p524_p5, %p523_p4 }
   0xd   :  { %p526_p7 = pnand %p525_p6, %p519_p3 }
   0xf   :  { %529 = shalt.err (!%p526_p7)
}
  0x10   :  { %23 = dma.hbm_to_vmem [thread:$0]  %s756_s0, 128, %s21_s25, [#allocation3]  }
  0x11   :  { %552 = dma.done.wait [#allocation3], 128  }
  0x12   :  { %553 = vsyncadd [#allocation3], 4294967168  ;;  %v557_v0 = vmov 0.0|0.0   ;;  %vm558_vm0 = vmmov 0   ;;  %v559_v1 = vmov 0.0   ;;  %v40_v2 = vld [vmem:[%s757_s1] sm:$0xff] }
  0x13   :  { %452 = vmatprep.subr.bf16.mxu0 %v557_v0  ;;  %379 = vmatprep.mubr.msk.f32.mxu0 %vm558_vm0, %v559_v1  ;;  %v41_v3 = vld [vmem:[%s757_s1 + $0x8] sm:$0xff]  ;;  %v124_v5 = vld [vmem:[%s759_s3] sm:$0xff]  ;;  %v126_v7 = vld [vmem:[%s759_s3 + $0x10] sm:$0xff]  ;;  %vm49_vm1 = vcmask 130048   ;;  %vm317_vm3 = vcmask 64512  }
  0x14   :  { %455 = vmatprep.subr.bf16.mxu1 %v557_v0  ;;  %414 = vmatprep.mubr.msk.f32.mxu1 %vm558_vm0, %v559_v1  ;;  %v453_v4 = vpack.c.bf16 %v41_v3, %v40_v2  ;;  %v125_v6 = vld [vmem:[%s759_s3 + $0x8] sm:$0xff]  ;;  %v127_v9 = vld [vmem:[%s759_s3 + $0x18] sm:$0xff]  ;;  %v39_v10 = vld [vmem:[#allocation2] sm:$0xff] }
  0x15   :  { %v456_v8 = vpack.c.bf16 %v125_v6, %v124_v5  ;;  %v459_v11 = vpack.c.bf16 %v127_v9, %v126_v7  ;;  %v128_v12 = vld [vmem:[%s759_s3 + $0x20] sm:$0xff]  ;;  %v129_v13 = vld [vmem:[%s759_s3 + $0x28] sm:$0xff]  ;;  %v130_v15 = vld [vmem:[%s759_s3 + $0x30] sm:$0xff] }
  0x16   :  { %454 = vmatpush3.bf16.msra.mxu0 %v453_v4  ;;  %v462_v14 = vpack.c.bf16 %v129_v13, %v128_v12  ;;  %v131_v16 = vld [vmem:[%s759_s3 + $0x38] sm:$0xff]  ;;  %v132_v18 = vld [vmem:[%s759_s3 + $0x40] sm:$0xff]  ;;  %v133_v19 = vld [vmem:[%s759_s3 + $0x48] sm:$0xff] }
  0x17   :  { %457 = vmatpush3.bf16.msra.mxu1 %v456_v8  ;;  %479 = vmatprep.subr.bf16.mxu0 %v557_v0  ;;  %v465_v17 = vpack.c.bf16 %v131_v16, %v130_v15  ;;  %v468_v20 = vpack.c.bf16 %v133_v19, %v132_v18  ;;  %v134_v21 = vld [vmem:[%s759_s3 + $0x50] sm:$0xff]  ;;  %v135_v22 = vld [vmem:[%s759_s3 + $0x58] sm:$0xff]  ;;  %v136_v24 = vld [vmem:[%s759_s3 + $0x60] sm:$0xff] }
  0x18   :  { %458 = vmatprep.subr.bf16.mxu1 %v557_v0  ;;  %v471_v23 = vpack.c.bf16 %v135_v22, %v134_v21  ;;  %v137_v25 = vld [vmem:[%s759_s3 + $0x68] sm:$0xff]  ;;  %v138_v27 = vld [vmem:[%s759_s3 + $0x70] sm:$0xff]  ;;  %v139_v28 = vld [vmem:[%s759_s3 + $0x78] sm:$0xff] }
  0x19   :  { %380 = vmatmul.mubr.msk.f32.vlgmr.msra.gmra.mrb[0].mxu0 %vm49_vm1, %v39_v10  ;;  %v474_v26 = vpack.c.bf16 %v137_v25, %v136_v24  ;;  %v477_v29 = vpack.c.bf16 %v139_v28, %v138_v27  ;;  %v218_v30 = vld [vmem:[%s761_s5] sm:$0xff]  ;;  %v219_v31 = vld [vmem:[%s761_s5 + $0x8] sm:$0xff]  ;;  %v220_v32 = vld [vmem:[%s761_s5 + $0x10] sm:$0xff] }
  0x1a   :  { %449 = vmatprep.mubr.msk.f32.mxu0 %vm558_vm0, %v559_v1  ;;  %v480_v33 = vpack.c.bf16 %v219_v31, %v218_v30  ;;  %v221_v34 = vld [vmem:[%s761_s5 + $0x18] sm:$0xff]  ;;  %v222_v36 = vld [vmem:[%s761_s5 + $0x20] sm:$0xff]  ;;  %v223_v37 = vld [vmem:[%s761_s5 + $0x28] sm:$0xff] }
  0x1b   :  { %460 = vmatpush3.bf16.msra.mxu1 %v459_v11  ;;  %v483_v35 = vpack.c.bf16 %v221_v34, %v220_v32  ;;  %v486_v38 = vpack.c.bf16 %v223_v37, %v222_v36  ;;  %v224_v39 = vld [vmem:[%s761_s5 + $0x30] sm:$0xff]  ;;  %v225_v40 = vld [vmem:[%s761_s5 + $0x38] sm:$0xff]  ;;  %v226_v42 = vld [vmem:[%s761_s5 + $0x40] sm:$0xff] }
  0x1c   :  { %461 = vmatprep.subr.bf16.mxu1 %v557_v0  ;;  %481 = vmatpush3.bf16.msra.mxu0 %v480_v33  ;;  %v489_v41 = vpack.c.bf16 %v225_v40, %v224_v39  ;;  %v227_v43 = vld [vmem:[%s761_s5 + $0x48] sm:$0xff]  ;;  %v228_v45 = vld [vmem:[%s761_s5 + $0x50] sm:$0xff]  ;;  %v229_v46 = vld [vmem:[%s761_s5 + $0x58] sm:$0xff] }
  0x1d   :  { %482 = vmatprep.subr.bf16.mxu0 %v557_v0  ;;  %v492_v44 = vpack.c.bf16 %v227_v43, %v226_v42  ;;  %v495_v47 = vpack.c.bf16 %v229_v46, %v228_v45  ;;  %v230_v48 = vld [vmem:[%s761_s5 + $0x60] sm:$0xff]  ;;  %v231_v49 = vld [vmem:[%s761_s5 + $0x68] sm:$0xff]  ;;  %v232_v56 = vld [vmem:[%s761_s5 + $0x70] sm:$0xff] }
  0x1e   :  { %v498_v50 = vpack.c.bf16 %v231_v49, %v230_v48  ;;  %v334_v51 = vld [vmem:[%s758_s2] ss:$0 sm:$0xff]  ;;  %v233_v57 = vld [vmem:[%s761_s5 + $0x78] sm:$0xff]  ;;  %s560_s5 = smov [#allocation5]  }
  0x1f   :  { %463 = vmatpush3.bf16.msra.mxu1 %v462_v14  ;;  %v501_v58 = vpack.c.bf16 %v233_v57, %v232_v56  ;;  %v336_v59 = vld [vmem:[%s760_s4] ss:$0 sm:$0xff]  ;;  %s325_s9 = sshll.u32 %s560_s5, 4  ;;  %s326_s9 = int_to_ptr.vmem [resolvable:$true] %s325_s9 }
  0x20   :  { %464 = vmatprep.subr.bf16.mxu1 %v557_v0  ;;  %484 = vmatpush3.bf16.msra.mxu0 %v483_v35  ;;  %v337_v1 = vld [vmem:[%s762_s6] ss:$0 sm:$0xff]  ;;  %s530_s4 = scalar_lea.vmem %s326_s9, 128  ;;  %p535_p9 = scmp.lt.s32.totalorder %s326_s9, %s326_s9 }
  0x21   :  { %485 = vmatprep.subr.bf16.mxu0 %v557_v0  ;;  %p531_p8 = scmp.ne.s32.totalorder %s326_s9, %s530_s4  ;;  %p536_p10 = scmp.lt.s32.totalorder %s530_s4, %s530_s4 }
  0x23   :  { %466 = vmatpush3.bf16.msra.mxu1 %v465_v17  ;;  %p537_p11 = por %p536_p10, %p535_p9 }
  0x24   :  { %467 = vmatprep.subr.bf16.mxu1 %v557_v0  ;;  %487 = vmatpush3.bf16.msra.mxu0 %v486_v38 }
  0x25   :  { %488 = vmatprep.subr.bf16.mxu0 %v557_v0  ;;  %p538_p12 = pnand %p537_p11, %p531_p8 }
  0x27   :  { %469 = vmatpush3.bf16.msra.mxu1 %v468_v20 }
  0x28   :  { %470 = vmatprep.subr.bf16.mxu1 %v557_v0  ;;  %490 = vmatpush3.bf16.msra.mxu0 %v489_v41 }
  0x29   :  { %491 = vmatprep.subr.bf16.mxu0 %v557_v0 }
  0x2b   :  { %472 = vmatpush3.bf16.msra.mxu1 %v471_v23 }
  0x2c   :  { %473 = vmatprep.subr.bf16.mxu1 %v557_v0  ;;  %493 = vmatpush3.bf16.msra.mxu0 %v492_v44 }
  0x2d   :  { %494 = vmatprep.subr.bf16.mxu0 %v557_v0 }
  0x2f   :  { %475 = vmatpush3.bf16.msra.mxu1 %v474_v26 }
  0x30   :  { %476 = vmatprep.subr.bf16.mxu1 %v557_v0  ;;  %496 = vmatpush3.bf16.msra.mxu0 %v495_v47 }
  0x31   :  { %497 = vmatprep.subr.bf16.mxu0 %v557_v0 }
  0x33   :  { %478 = vmatpush3.bf16.msra.mxu1 %v477_v29 }
  0x34   :  { %499 = vmatpush3.bf16.msra.mxu0 %v498_v50 }
  0x35   :  { %500 = vmatprep.subr.bf16.mxu0 %v557_v0  ;;  %v311_v0 = vlaneseq }
  0x37   :  { %v312_v3 = vand.u32 127, %v311_v0 }
  0x38   :  { %502 = vmatpush3.bf16.msra.mxu0 %v501_v58 }
  0x39   :  { %vm313_vm2 = vcmp.ge.s32.totalorder %v312_v3, 4 }
  0xec   :  { %v119_v52 = vpop.f32.mrb[0].mxu0 }
  0xed   :  { %v120_v53 = vadd.f32 %v334_v51, %v119_v52  ;;  %v381_v54 = vpop.f32.mrb[1].mxu0 }
  0xef   :  { %v123_v55 = vmax.f32 %v120_v53, 0.0 }
  0xf1   :  { %415 = vmatmul.mubr.f32.vlgmr.msra.gmra.mrb[0].mxu1 %v123_v55 }
 0x1c4   :  { %v213_v60 = vpop.f32.mrb[0].mxu1 }
 0x1c5   :  { %v214_v61 = vadd.f32 %v336_v59, %v213_v60  ;;  %v416_v62 = vpop.f32.mrb[1].mxu1 }
 0x1c7   :  { %v217_v63 = vmax.f32 %v214_v61, 0.0 }
 0x1c9   :  { %450 = vmatmul.mubr.f32.vlgmr.msra.gmra.mrb[2].mxu0 %v217_v63 }
 0x29c   :  { %v307_v2 = vpop.f32.mrb[2].mxu0 }
 0x29d   :  { %v308_v4 = vadd.f32 %v337_v1, %v307_v2  ;;  %v451_v5 = vpop.f32.mrb[3].mxu0 }
 0x29f   :  { %v314_v6 = vmax.f32 %v308_v4, -20.0 }
 0x2a1   :  { %v315_v7 = vmin.f32 %v314_v6, 2.0 }
 0x2a3   :  { %v316_v8 = vsel %vm313_vm2, %v315_v7, %v308_v4 }
 0x2a4   :  { %318 = vst.msk [vmem:[#allocation5] sm:$0xff] %vm317_vm3, %v316_v8 }
 0x2a5   :  { %541 = shalt.err (!%p538_p12)
}
 0x2a6   :  { %s542_s11 = scalar_lea.hbm %s763_s7, 128 }
 0x2a7   :  { %p543_p13 = scmp.ne.s32.totalorder %s763_s7, %s542_s11  ;;  %p546_p0 = scmp.lt.u32.totalorder %s542_s11, %s763_s7 }
 0x2a9   :  { %p548_p1 = pnand %p546_p0, %p543_p13 }
 0x2ab   :  { %551 = shalt.err (!%p548_p1)
}
 0x2ac   :  { %328 = dma.vmem_to_hbm [thread:$0]  %s326_s9, 128, %s763_s7, [#allocation4]  }
 0x2ad   :  { %554 = dma.done.wait [#allocation4], 128  }
 0x2ae   :  { %555 = vsyncadd [#allocation4], 4294967168 }
 0x2af   :  { %332 = vsyncpa [#allocation3], 1 }
 0x2b0   :  { %333 = vsyncpa [#allocation4], 1 }

</bundles_post_ra>
